<compile_context>
chip_gen: v6e
topology: v6e:2x2x1
jax: 0.10.0
libtpu: 0.0.40
codegen_flags: <defaults>
</compile_context>

<pallas_src>
import functools

import jax
import jax.numpy as jnp
from jax.experimental import pallas as pl
from jax.experimental.pallas import tpu as pltpu


def _round_up(x, m):
    return (x + m - 1) // m * m


def _patch_embed_kernel(p_ref, w_ref, b_ref, o_ref):
    # p_ref: (TM, K_pad) bf16 patches tile, w_ref: (K_pad, N_pad) bf16 weight
    # (resident), b_ref: (1, N_pad) f32 bias (resident), o_ref: (TM, N_pad) f32.
    acc = jnp.dot(p_ref[...], w_ref[...], preferred_element_type=jnp.float32)
    o_ref[...] = (acc + b_ref[...]).astype(o_ref.dtype)


def prepare_patch_embed_params(weight, bias, compute_dtype=jnp.bfloat16):
    """Flatten/pad Conv2d weight (D, C, P, P) and bias (D,) once, off the hot path."""
    embed_dim, C, P, _ = weight.shape
    K = C * P * P
    K_pad = _round_up(K, 128)
    N_pad = _round_up(embed_dim, 128)
    # (D, C, P, P) -> (K, D); matmul with (C, kh, kw)-ordered patches == conv2d.
    w2d = weight.reshape(embed_dim, K).T.astype(compute_dtype)
    w2d = jnp.pad(w2d, ((0, K_pad - K), (0, N_pad - embed_dim)))
    b2d = jnp.pad(bias.astype(jnp.float32).reshape(1, embed_dim),
                  ((0, 0), (0, N_pad - embed_dim)))
    return w2d, b2d


def q_patch_embed(x, w2d, b2d, patch_size, embed_dim,
                  compute_dtype=jnp.bfloat16, row_tile=256):
    """x: (B, C, H, W) NCHW; w2d/b2d from prepare_patch_embed_params.

    Returns (B, num_patches, embed_dim) float32, matching
    proj(x).flatten(2).transpose(1, 2) of the PyTorch module (bf16 matmul,
    f32 accumulation).
    """
    B, C, H, W = x.shape
    P = patch_size
    assert H % P == 0 and W % P == 0, "image size must be divisible by patch size"
    nH, nW = H // P, W // P
    num_patches = nH * nW

    K = C * P * P
    K_pad, N_pad = w2d.shape
    M = B * num_patches

    # Row tile: 256 keeps double-buffered bf16 tiles tiny even on v7x's 64 MiB
    # VMEM; clamp (to a multiple of 8 sublanes) for small problems.
    TM = row_tile if M >= row_tile else _round_up(M, 8)
    M_pad = _round_up(M, TM)

    # --- patchify (matches Conv2d with kernel=stride=P, (C, kh, kw) flatten) --
    # (B, C, nH, P, nW, P) -> (B, nH, nW, C, P, P) -> (M, K); pad M and K.
    patches = x.reshape(B, C, nH, P, nW, P)
    patches = patches.transpose(0, 2, 4, 1, 3, 5)
    patches = patches.reshape(M, K).astype(compute_dtype)
    patches = jnp.pad(patches, ((0, M_pad - M), (0, K_pad - K)))

    cost = pl.CostEstimate(
        flops=2 * M_pad * K_pad * N_pad,
        transcendentals=0,
        bytes_accessed=(M_pad * K_pad * patches.dtype.itemsize   # patches read
                        + K_pad * N_pad * w2d.dtype.itemsize      # weight read (once)
                        + N_pad * 4                               # bias read (once)
                        + M_pad * N_pad * 4),                     # f32 output write
    )

    out = pl.pallas_call(
        _patch_embed_kernel,
        out_shape=jax.ShapeDtypeStruct((M_pad, N_pad), jnp.float32),
        grid=(M_pad // TM,),
        in_specs=[
            pl.BlockSpec((TM, K_pad), lambda i: (i, 0)),      # stream row tiles
            pl.BlockSpec((K_pad, N_pad), lambda i: (0, 0)),   # weight resident
            pl.BlockSpec((1, N_pad), lambda i: (0, 0)),       # bias resident
        ],
        out_specs=pl.BlockSpec((TM, N_pad), lambda i: (i, 0)),
        compiler_params=pltpu.CompilerParams(
            dimension_semantics=("parallel",),   # v7x: shard M-tiles over 2 TCs
            vmem_limit_bytes=32 * 1024 * 1024,
        ),
        cost_estimate=cost,
    )(patches, w2d, b2d)

    out = out[:M, :embed_dim]
    return out.reshape(B, num_patches, embed_dim)


if __name__ == "__main__":
    # Small shapes consistent with the module: img=16, patch=4, in_chans=4, embed_dim=32
    B, C, H, W = 2, 4, 16, 16
    P = 4
    embed_dim = 32

    key = jax.random.PRNGKey(0)
    kx, kw, kb = jax.random.split(key, 3)
    x = jax.random.normal(kx, (B, C, H, W), dtype=jnp.float32)
    weight = jax.random.normal(kw, (embed_dim, C, P, P), dtype=jnp.float32) * 0.02
    bias = jax.random.normal(kb, (embed_dim,), dtype=jnp.float32) * 0.02

    # Weight flatten/pad done once, outside the per-call path.
    w2d, b2d = prepare_patch_embed_params(weight, bias)

    fwd = jax.jit(functools.partial(q_patch_embed, patch_size=P, embed_dim=embed_dim))
    out = fwd(x, w2d, b2d)
    out = jax.block_until_ready(out)

    # Sanity check vs plain-JAX f32 conv reference (bf16 matmul => relaxed tol).
    ref = jax.lax.conv_general_dilated(
        x, weight, window_strides=(P, P), padding="VALID",
        dimension_numbers=("NCHW", "OIHW", "NCHW"),
    ) + bias.reshape(1, embed_dim, 1, 1)
    ref = ref.reshape(B, embed_dim, -1).transpose(0, 2, 1)

    assert out.shape == (B, (H // P) * (W // P), embed_dim)
    assert jnp.allclose(out, ref, atol=2e-2, rtol=2e-2), \
        float(jnp.max(jnp.abs(out - ref)))

    print("KERNEL_OK")
</pallas_src>

<mosaic_0001>
module attributes {stable_mosaic.version = 11 : i64} {
  func.func @_patch_embed_kernel(%arg0: i32, %arg1: memref<32x128xbf16, #tpu.memory_space<vmem>>, %arg2: memref<128x128xbf16, #tpu.memory_space<vmem>>, %arg3: memref<1x128xf32, #tpu.memory_space<vmem>>, %arg4: memref<32x128xf32, #tpu.memory_space<vmem>>) attributes {dimension_semantics = [#tpu.dimension_semantics<parallel>], iteration_bounds = array<i64: 1>, scalar_prefetch = 0 : i64, scratch_operands = 0 : i64, tpu.core_type = #tpu.core_type<tc>, window_params = [{transform_indices = @transform_0, window_bounds = array<i64: 32, 128>}, {pipeline_mode = #tpu.pipeline_mode<synchronous>, transform_indices = @transform_1, window_bounds = array<i64: 128, 128>}, {pipeline_mode = #tpu.pipeline_mode<synchronous>, transform_indices = @transform_2, window_bounds = array<i64: 1, 128>}, {transform_indices = @transform_3, window_bounds = array<i64: 32, 128>}]} {
    %c0 = arith.constant 0 : index
    %c0_0 = arith.constant 0 : index
    %0 = vector.load %arg1[%c0, %c0_0] : memref<32x128xbf16, #tpu.memory_space<vmem>>, vector<32x128xbf16>
    %c0_1 = arith.constant 0 : index
    %c0_2 = arith.constant 0 : index
    %1 = vector.load %arg2[%c0_1, %c0_2] : memref<128x128xbf16, #tpu.memory_space<vmem>>, vector<128x128xbf16>
    %cst = arith.constant dense<0.000000e+00> : vector<32x128xf32>
    %2 = tpu.matmul %0, %1, %cst {dimension_numbers = #tpu.dot_dimension_numbers<[1], [0], [0], [1], [0, 0, 1, 1], [], []>} : vector<32x128xbf16>, vector<128x128xbf16>, vector<32x128xf32> -> vector<32x128xf32>
    %c0_3 = arith.constant 0 : index
    %c0_4 = arith.constant 0 : index
    %3 = vector.load %arg3[%c0_3, %c0_4] : memref<1x128xf32, #tpu.memory_space<vmem>>, vector<1x128xf32>
    %4 = vector.broadcast %3 : vector<1x128xf32> to vector<32x128xf32>
    %5 = arith.addf %2, %4 : vector<32x128xf32>
    %c0_5 = arith.constant 0 : index
    %c0_6 = arith.constant 0 : index
    %6 = vector.load %arg4[%c0_5, %c0_6] : memref<32x128xf32, #tpu.memory_space<vmem>>, vector<32x128xf32>
    tpu.vector_store %arg4[%c0_5, %c0_6], %5 {strides = array<i32>} : memref<32x128xf32, #tpu.memory_space<vmem>>, vector<32x128xf32>,
    return
  }
  func.func @transform_0(%arg0: i32) -> (i32, i32) {
    %c0_i32 = arith.constant 0 : i32
    %c0_i32_0 = arith.constant 0 : i32
    return %arg0, %c0_i32 : i32, i32
  }
  func.func @transform_1(%arg0: i32) -> (i32, i32) {
    %c0_i32 = arith.constant 0 : i32
    %c0_i32_0 = arith.constant 0 : i32
    %c0_i32_1 = arith.constant 0 : i32
    return %c0_i32, %c0_i32_0 : i32, i32
  }
  func.func @transform_2(%arg0: i32) -> (i32, i32) {
    %c0_i32 = arith.constant 0 : i32
    %c0_i32_0 = arith.constant 0 : i32
    %c0_i32_1 = arith.constant 0 : i32
    return %c0_i32, %c0_i32_0 : i32, i32
  }
  func.func @transform_3(%arg0: i32) -> (i32, i32) {
    %c0_i32 = arith.constant 0 : i32
    %c0_i32_0 = arith.constant 0 : i32
    return %arg0, %c0_i32 : i32, i32
  }
}

</mosaic_0001>

<bundles_post_ra>
// kernel: q_patch_embed.1
= control target key start
LH: loop header
LB: loop body
LE: loop exit
PB: predicated region body
PF: predicated region fallthrough
CT: control target
= control target key end

     0   :  { %s307_s0 = inlined_call_operand.vmem [shape: bf16[32,128], index: 0, kind: input, shape index: {}]   ;;  %s308_s1 = inlined_call_operand.vmem [shape: bf16[128,128], index: 1, kind: input, shape index: {}]   ;;  %s309_s2 = inlined_call_operand.vmem [shape: f32[1,128], index: 2, kind: input, shape index: {}]   ;;  %s310_s3 = inlined_call_operand.hbm [shape: f32[32,128], index: 3, kind: output, shape index: {}]  }
   0x1   :  { %v216_v0 = vld [vmem:[%s308_s1 + $0x38] sm:$0xff]   ;;  %v217_v1 = vld [vmem:[%s308_s1 + $0x30] sm:$0xff]   ;;  %v218_v2 = vld [vmem:[%s308_s1 + $0x28] sm:$0xff]  }
   0x2   :  { %193 = vmatprep.subr.bf16.mxu0 %v216_v0  ;;  %v219_v3 = vld [vmem:[%s308_s1 + $0x20] sm:$0xff]  }
   0x3   :  { %194 = vmatpush3.bf16.msra.mxu0 %v216_v0  ;;  %v224_v4 = vld [vmem:[%s307_s0] sm:$0xff]  }
   0x4   :  { %195 = vmatprep.subr.bf16.mxu0 %v217_v1  ;;  %209 = vmatprep.mubr.bf16.mxu0 %v224_v4 }
   0x7   :  { %196 = vmatpush3.bf16.msra.mxu0 %v217_v1 }
   0x8   :  { %197 = vmatprep.subr.bf16.mxu0 %v218_v2 }
   0x9   :  { %8 = vsyncpa [#allocation3], 0  ;;  %v220_v5 = vld [vmem:[%s308_s1 + $0x18] sm:$0xff]   ;;  %v221_v6 = vld [vmem:[%s308_s1 + $0x10] sm:$0xff]   ;;  %s248_s7 = smov [#allocation2]  }
   0xa   :  { %v222_v7 = vld [vmem:[%s308_s1 + $0x8] sm:$0xff]   ;;  %v223_v8 = vld [vmem:[%s308_s1] sm:$0xff]   ;;  %s161_s8 = sshll.u32 %s248_s7, 4  ;;  %s162_s8 = int_to_ptr.vmem [resolvable:$true] %s161_s8 }
   0xb   :  { %198 = vmatpush3.bf16.msra.mxu0 %v218_v2  ;;  %v225_v9 = vld [vmem:[%s307_s0 + $0x8] sm:$0xff]   ;;  %v172_v10 = vld [vmem:[%s309_s2] ss:$0 sm:$0xff]  ;;  %s226_s0 = scalar_lea.vmem %s162_s8, 512  ;;  %p231_p1 = scmp.lt.s32.totalorder %s162_s8, %s162_s8 }
   0xc   :  { %199 = vmatprep.subr.bf16.mxu0 %v219_v3  ;;  %p227_p0 = scmp.ne.s32.totalorder %s162_s8, %s226_s0  ;;  %p232_p2 = scmp.lt.s32.totalorder %s226_s0, %s226_s0 }
   0xe   :  { %p233_p3 = por %p232_p2, %p231_p1 }
   0xf   :  { %200 = vmatpush3.bf16.msra.mxu0 %v219_v3 }
  0x10   :  { %201 = vmatprep.subr.bf16.mxu0 %v220_v5  ;;  %p234_p4 = pnand %p233_p3, %p227_p0 }
  0x13   :  { %202 = vmatpush3.bf16.msra.mxu0 %v220_v5 }
  0x14   :  { %203 = vmatprep.subr.bf16.mxu0 %v221_v6 }
  0x17   :  { %204 = vmatpush3.bf16.msra.mxu0 %v221_v6 }
  0x18   :  { %205 = vmatprep.subr.bf16.mxu0 %v222_v7 }
  0x1b   :  { %206 = vmatpush3.bf16.msra.mxu0 %v222_v7 }
  0x1c   :  { %207 = vmatprep.subr.bf16.mxu0 %v223_v8 }
  0x1f   :  { %208 = vmatpush3.bf16.msra.mxu0 %v223_v8 }
  0x22   :  { %210 = vmatmul.mubr.bf16.vlgmr.msra.gmra.mxu0 %v225_v9 }
  0xe2   :  { %v211_v11 = vpop.f32.mrf.mxu0 }
  0xe3   :  { %v146_v12 = vadd.f32 %v211_v11, %v172_v10 }
  0xe4   :  { %v137_v13 = vpop.f32.mrf.mxu0 }
  0xe5   :  { %154 = vst [vmem:[#allocation2 + $0x10] sm:$0xff] %v146_v12  ;;  %v138_v14 = vadd.f32 %v172_v10, %v137_v13 }
  0xe6   :  { %v212_v15 = vpop.f32.mrf.mxu0 }
  0xe7   :  { %152 = vst [vmem:[#allocation2] sm:$0xff] %v138_v14  ;;  %v149_v16 = vadd.f32 %v212_v15, %v172_v10 }
  0xe8   :  { %v140_v17 = vpop.f32.mrf.mxu0 }
  0xe9   :  { %155 = vst [vmem:[#allocation2 + $0x18] sm:$0xff] %v149_v16  ;;  %v141_v18 = vadd.f32 %v172_v10, %v140_v17 }
  0xeb   :  { %153 = vst [vmem:[#allocation2 + $0x8] sm:$0xff] %v141_v18 }
  0xec   :  { %237 = shalt.err (!%p234_p4)
}
  0xed   :  { %s249_s1 = smov 128   ;;  %s250_s2 = smov 8  }
  0xee   :  { %167 = dma.vmem_to_hbm [thread:$0]  %s162_s8, 512, %s310_s3, [#allocation3], %s249_s1, %s249_s1, %s250_s2  }
  0xef   :  { %246 = dma.done.wait [#allocation3], 512  }
  0xf0   :  { %247 = vsyncadd [#allocation3], 4294966784 }
  0xf1   :  { %171 = vsyncpa [#allocation3], 1 }

</bundles_post_ra>
